<compile_context>
chip_gen: v6e
topology: v6e:2x2x1
jax: 0.10.0
libtpu: 0.0.40
codegen_flags: <defaults>
</compile_context>

<pallas_src>
import jax
import jax.numpy as jnp
from jax import lax
from jax.experimental import pallas as pl
from jax.experimental.pallas import tpu as pltpu


def scorer_kernel(lab_ref, t1_ref, hrow_ref,
                  wl0_ref, wl1_ref, bl0_ref, bl1_ref,
                  w1bc_ref, w2r_ref, b2_ref,
                  out_ref,
                  sel_sc, lc_sc, acc_sc):
    # Grid: (batch_tiles, n_tiles_over_4H). Per step:
    #   lab_ref : (TBC, H)  bf16   flattened label rows of this batch tile
    #   t1_ref  : (TB, H)   bf16   t1 per batch row (expanded in-kernel)
    #   hrow_ref: (TB, TN)  bf16   t0 @ W1[:H] + b1 per batch row, N-tiled
    #   wl0/wl1 : (H, H)    bf16   proj_label split into l0 / l1 halves
    #   bl0/bl1 : (1, H)    f32
    #   w1bc_ref: (2H, TN)  bf16   W1 rows H:3H ([l0 | t1*l1] branch), N-tiled
    #   w2r_ref : (1, TN)   f32    W2 as a row, N-tiled
    #   b2_ref  : (1, 1)    f32
    #   out_ref : (TB, C)   f32    resident across the N axis
    # Scratch:
    #   sel_sc  : (TBC, TB) bf16   one-hot class-expansion matrix
    #   lc_sc   : (TBC, 2H) bf16   [l0 | t1*l1]
    #   acc_sc  : (TBC, L)  f32    per-lane-block score accumulator
    n = pl.program_id(1)
    TBC, H = lab_ref.shape
    TB = hrow_ref.shape[0]
    C = TBC // TB
    TN = w2r_ref.shape[1]
    LANE = acc_sc.shape[1]

    @pl.when(n == 0)
    def _init():
        # One-hot class-expansion matrix built from iota range compares
        # (no integer div/rem, no HBM constant stream).
        rr = lax.broadcasted_iota(jnp.int32, (TBC, TB), 0)
        bb = lax.broadcasted_iota(jnp.int32, (TBC, TB), 1)
        onehot = (rr >= bb * C) & (rr < bb * C + C)
        sel_sc[...] = jnp.where(onehot, 1.0, 0.0).astype(sel_sc.dtype)

        # Fused label projection, written directly into the two halves of lc.
        lab = lab_ref[...]
        l0 = jnp.dot(lab, wl0_ref[...],
                     preferred_element_type=jnp.float32) + bl0_ref[...]
        l1 = jnp.dot(lab, wl1_ref[...],
                     preferred_element_type=jnp.float32) + bl1_ref[...]
        t1e = jnp.dot(sel_sc[...], t1_ref[...],
                      preferred_element_type=jnp.float32)          # t1 per class
        if H % 128 == 0:                       # lane-aligned half writes
            lc_sc[:, :H] = l0.astype(lc_sc.dtype)
            lc_sc[:, H:] = (t1e * l1).astype(lc_sc.dtype)
        else:                                  # fallback for exotic H
            lc_sc[...] = jnp.concatenate([l0, t1e * l1],
                                         axis=-1).astype(lc_sc.dtype)
        acc_sc[...] = jnp.zeros_like(acc_sc)

    # Hidden-layer 4H tile: text branch via the tiny class-expansion matmul
    # (includes b1), plus the fused K=2H label/product matmul.
    h = jnp.dot(sel_sc[...], hrow_ref[...], preferred_element_type=jnp.float32)
    h = h + jnp.dot(lc_sc[...], w1bc_ref[...], preferred_element_type=jnp.float32)
    # TODO(synk): nn.Dropout(p=0.1) is identity in eval mode; training-mode dropout not implemented.
    h = jnp.maximum(h, 0.0)                                         # ReLU (f32 VPU)

    # Partial W2 contraction: VPU multiply + VPU-only lane-block accumulation
    # (cross-lane reduce deferred to finalize to keep the XLU off the hot loop).
    hw = h * w2r_ref[...]
    part = hw[:, :LANE]
    for j in range(1, TN // LANE):
        part = part + hw[:, j * LANE:(j + 1) * LANE]
    acc_sc[...] += part

    @pl.when(n == pl.num_programs(1) - 1)
    def _finalize():
        # Single deferred cross-lane reduce -> (TBC, 1) score column.
        score = jnp.sum(acc_sc[...], axis=-1, keepdims=True)

        # Fold (TBC, 1) -> lane-dense (TB, C) with iota-built selectors.
        bb = lax.broadcasted_iota(jnp.int32, (TB, TBC), 0)
        rr = lax.broadcasted_iota(jnp.int32, (TB, TBC), 1)
        sel_rows = jnp.where((rr >= bb * C) & (rr < bb * C + C), 1.0, 0.0)

        # r % C == r - C * (r // C); r // C recovered from the one-hot by a
        # tiny matvec (avoids vector integer div/rem).
        barange = lax.broadcasted_iota(jnp.int32, (TB, 1), 0).astype(jnp.float32)
        bidx = jnp.dot(sel_sc[...].astype(jnp.float32), barange,
                       preferred_element_type=jnp.float32)          # (TBC, 1)
        r_col = lax.broadcasted_iota(jnp.int32, (TBC, 1), 0).astype(jnp.float32)
        rmod = r_col - jnp.float32(C) * bidx                         # (TBC, 1)
        cid = lax.broadcasted_iota(jnp.int32, (TBC, C), 1).astype(jnp.float32)
        sel_cols = jnp.where(rmod == cid, 1.0, 0.0)                  # (TBC, C)

        out_ref[...] = (jnp.dot(sel_rows, score * sel_cols,
                                preferred_element_type=jnp.float32)
                        + b2_ref[...])


def scorer_weighted_dot(text_rep, label_rep, params, *,
                        block_b=None, block_n=None, vmem_limit_bytes=None):
    B, H = text_rep.shape
    _, C, _ = label_rep.shape
    wt, bt, wl, bl, w1, b1, w2, b2 = params
    H2, N4 = 2 * H, 4 * H

    # ---- hoisted text-side work (tiny, MXU-hostile shapes; once in XLA) ----
    t = text_rep @ wt + bt                          # (B, 2H)
    t0, t1 = t[:, :H], t[:, H:]
    hrow = t0 @ w1[:H, :] + b1                      # (B, 4H): t0 branch of W1 + b1

    # MXU operands in bf16 (f32 accumulation inside the kernel);
    # biases / w2 / b2 stay f32 for the VPU epilogue.
    lab_flat = label_rep.reshape(B * C, H).astype(jnp.bfloat16)
    t1_bf = t1.astype(jnp.bfloat16)
    hrow_bf = hrow.astype(jnp.bfloat16)
    wl0 = wl[:, :H].astype(jnp.bfloat16)
    wl1 = wl[:, H:].astype(jnp.bfloat16)
    bl0, bl1 = bl[:, :H], bl[:, H:]
    w1bc = w1[H:, :].astype(jnp.bfloat16)           # (2H, 4H): [l0 | t1*l1] rows
    w2r = w2.reshape(1, N4)                         # f32 row for the VPU reduce
    b2r = b2.reshape(1, 1)

    # ---- tiling ----
    if block_b is None:
        # Keep TB*C (MXU M dim / scratch rows) around <= 1024 while preserving
        # divisibility and bf16 sublane alignment; also yields >= 2 batch tiles
        # for large B so v7x can shard the parallel axis across both TensorCores.
        TB = B
        while TB % 2 == 0 and TB * C > 1024 and (TB // 2) % 16 == 0:
            TB //= 2
    else:
        TB = block_b
    assert B % TB == 0
    if TB < B:
        assert TB % 16 == 0 and (TB * C) % 16 == 0, \
            "partial batch tiles need bf16 sublane alignment (multiples of 16)"

    if block_n is None:
        # Keep the full 4H resident when it is modest (one N step per batch
        # tile); stream W1 in 512-wide slabs when it is large (v7x 64 MiB VMEM).
        TN = N4 if N4 <= 2048 else 512
    else:
        TN = block_n
    assert N4 % TN == 0 and (TN == N4 or TN % 128 == 0)
    TBC = TB * C
    LANE = 128 if TN % 128 == 0 else TN

    if vmem_limit_bytes is None:
        try:
            cap = int(pltpu.get_tpu_info().vmem_capacity_bytes)
        except Exception:
            cap = 64 * 1024 * 1024
        vmem_limit_bytes = max(32 * 1024 * 1024,
                               min((cap * 3) // 4, 96 * 1024 * 1024))

    n_bt = B // TB
    grid = (n_bt, N4 // TN)

    # Advisory cost estimate (weights that are re-DMA'd per batch tile counted as such).
    flops = (2 * B * C * H * H2          # in-kernel label projection
             + 2 * B * C * TB * H        # t1 class-expansion matmul
             + 2 * B * C * TB * N4       # hrow class-expansion matmuls
             + 2 * B * C * H2 * N4       # fused [l0 | t1*l1] @ W1[H:3H]
             + 2 * B * C * N4)           # w2 VPU contraction
    nbytes = lambda a: a.size * a.dtype.itemsize
    bytes_accessed = (nbytes(lab_flat) + nbytes(t1_bf) + nbytes(hrow_bf)
                      + nbytes(wl0) + nbytes(wl1) + nbytes(bl0) + nbytes(bl1)
                      + nbytes(b2r)
                      + n_bt * (nbytes(w1bc) + nbytes(w2r))
                      + B * C * 4)

    const = lambda shape: pl.BlockSpec(shape, lambda bi, n: (0, 0))

    out = pl.pallas_call(
        scorer_kernel,
        out_shape=jax.ShapeDtypeStruct((B, C), jnp.float32),
        grid_spec=pltpu.PrefetchScalarGridSpec(
            num_scalar_prefetch=0,
            grid=grid,
            in_specs=[
                pl.BlockSpec((TBC, H), lambda bi, n: (bi, 0)),   # lab_flat
                pl.BlockSpec((TB, H), lambda bi, n: (bi, 0)),    # t1
                pl.BlockSpec((TB, TN), lambda bi, n: (bi, n)),   # hrow
                const(wl0.shape), const(wl1.shape),              # wl halves
                const(bl0.shape), const(bl1.shape),              # bl halves
                pl.BlockSpec((H2, TN), lambda bi, n: (0, n)),    # W1[H:3H]
                pl.BlockSpec((1, TN), lambda bi, n: (0, n)),     # w2 row
                const(b2r.shape),                                # b2
            ],
            out_specs=pl.BlockSpec((TB, C), lambda bi, n: (bi, 0)),
            scratch_shapes=[
                pltpu.VMEM((TBC, TB), jnp.bfloat16),   # class-expansion one-hot
                pltpu.VMEM((TBC, H2), jnp.bfloat16),   # [l0 | t1*l1]
                pltpu.VMEM((TBC, LANE), jnp.float32),  # lane-block score acc
            ]),
        compiler_params=pltpu.CompilerParams(
            dimension_semantics=("parallel", "arbitrary"),
            vmem_limit_bytes=int(vmem_limit_bytes)),
        cost_estimate=pl.CostEstimate(flops=int(flops), transcendentals=0,
                                      bytes_accessed=int(bytes_accessed)),
    )(lab_flat, t1_bf, hrow_bf, wl0, wl1, bl0, bl1, w1bc, w2r, b2r)
    return out


def init_params(key, H):
    # Deterministic init mimicking PyTorch Linear default (U[-1/sqrt(fan_in), +]).
    # Weights stored TRANSPOSED ([in, out]); biases stored as [1, out] rows.
    ks = jax.random.split(key, 8)

    def lin(kw, kb, fan_in, fan_out):
        bound = 1.0 / jnp.sqrt(fan_in)
        w = jax.random.uniform(kw, (fan_in, fan_out), jnp.float32, -bound, bound)
        b = jax.random.uniform(kb, (1, fan_out), jnp.float32, -bound, bound)
        return w, b

    wt, bt = lin(ks[0], ks[1], H, 2 * H)        # proj_text
    wl, bl = lin(ks[2], ks[3], H, 2 * H)        # proj_label
    w1, b1 = lin(ks[4], ks[5], 3 * H, 4 * H)    # out_mlp[0]
    w2, b2 = lin(ks[6], ks[7], 4 * H, 1)        # out_mlp[3]
    return wt, bt, wl, bl, w1, b1, w2, b2


def reference(text_rep, label_rep, params):
    wt, bt, wl, bl, w1, b1, w2, b2 = params
    B, H = text_rep.shape
    C = label_rep.shape[1]
    t = text_rep @ wt + bt                      # (B, 2H)
    l = label_rep @ wl + bl                     # (B, C, 2H)
    t0, t1 = t[:, :H], t[:, H:]
    l0, l1 = l[..., :H], l[..., H:]
    t0b = jnp.broadcast_to(t0[:, None, :], (B, C, H))
    cat = jnp.concatenate([t0b, l0, t1[:, None, :] * l1], axis=-1)   # (B, C, 3H)
    h = jnp.maximum(cat @ w1 + b1, 0.0)
    s = h @ w2 + b2
    return s.reshape(B, C)


if __name__ == "__main__":
    B, C, H = 2, 8, 128
    key = jax.random.PRNGKey(0)
    k_text, k_label, k_param = jax.random.split(key, 3)

    text_rep = jax.random.normal(k_text, (B, H), jnp.float32)
    label_rep = jax.random.normal(k_label, (B, C, H), jnp.float32)
    params = init_params(k_param, H)

    # block_n=256 -> two 4H tiles: exercises the init / accumulate / finalize
    # path and the deferred lane-block reduction (LANE=128, 2 blocks per step).
    scores = scorer_weighted_dot(text_rep, label_rep, params, block_n=256)
    jax.block_until_ready(scores)

    ref = reference(text_rep, label_rep, params)
    assert scores.shape == (B, C)
    # bf16 MXU operands with f32 accumulation -> loosened tolerance vs f32 ref.
    assert jnp.allclose(scores, ref, atol=3e-2, rtol=3e-2), (scores, ref)
    print("KERNEL_OK")
</pallas_src>

<mosaic_0001>
module attributes {stable_mosaic.version = 11 : i64} {
  func.func @scorer_kernel(%arg0: i32, %arg1: i32, %arg2: memref<16x128xbf16, #tpu.memory_space<vmem>>, %arg3: memref<2x128xbf16, #tpu.memory_space<vmem>>, %arg4: memref<2x256xbf16, #tpu.memory_space<vmem>>, %arg5: memref<128x128xbf16, #tpu.memory_space<vmem>>, %arg6: memref<128x128xbf16, #tpu.memory_space<vmem>>, %arg7: memref<1x128xf32, #tpu.memory_space<vmem>>, %arg8: memref<1x128xf32, #tpu.memory_space<vmem>>, %arg9: memref<256x256xbf16, #tpu.memory_space<vmem>>, %arg10: memref<1x256xf32, #tpu.memory_space<vmem>>, %arg11: memref<1x1xf32, #tpu.memory_space<vmem>>, %arg12: memref<2x8xf32, #tpu.memory_space<vmem>>, %arg13: memref<16x2xbf16, #tpu.memory_space<vmem>>, %arg14: memref<16x256xbf16, #tpu.memory_space<vmem>>, %arg15: memref<16x128xf32, #tpu.memory_space<vmem>>) attributes {dimension_semantics = [#tpu.dimension_semantics<parallel>, #tpu.dimension_semantics<arbitrary>], iteration_bounds = array<i64: 1, 2>, scalar_prefetch = 0 : i64, scratch_operands = 3 : i64, tpu.core_type = #tpu.core_type<tc>, window_params = [{transform_indices = @transform_0, window_bounds = array<i64: 16, 128>}, {transform_indices = @transform_1, window_bounds = array<i64: 2, 128>}, {transform_indices = @transform_2, window_bounds = array<i64: 2, 256>}, {pipeline_mode = #tpu.pipeline_mode<synchronous>, transform_indices = @transform_3, window_bounds = array<i64: 128, 128>}, {pipeline_mode = #tpu.pipeline_mode<synchronous>, transform_indices = @transform_4, window_bounds = array<i64: 128, 128>}, {pipeline_mode = #tpu.pipeline_mode<synchronous>, transform_indices = @transform_5, window_bounds = array<i64: 1, 128>}, {pipeline_mode = #tpu.pipeline_mode<synchronous>, transform_indices = @transform_6, window_bounds = array<i64: 1, 128>}, {transform_indices = @transform_7, window_bounds = array<i64: 256, 256>}, {transform_indices = @transform_8, window_bounds = array<i64: 1, 256>}, {pipeline_mode = #tpu.pipeline_mode<synchronous>, transform_indices = @transform_9, window_bounds = array<i64: 1, 1>}, {transform_indices = @transform_10, window_bounds = array<i64: 2, 8>}]} {
    %c0_i32 = arith.constant 0 : i32
    %0 = arith.cmpi eq, %arg1, %c0_i32 : i32
    %1 = arith.extui %0 : i1 to i32
    %c0_i32_0 = arith.constant 0 : i32
    %2 = arith.cmpi ne, %1, %c0_i32_0 : i32
    scf.if %2 {
      %24 = tpu.iota {dimensions = array<i32: 0>} : vector<16x2xi32>
      %25 = tpu.iota {dimensions = array<i32: 1>} : vector<16x2xi32>
      %c8_i32 = arith.constant 8 : i32
      %26 = vector.broadcast %c8_i32 : i32 to vector<16x2xi32>
      %27 = arith.muli %25, %26 : vector<16x2xi32>
      %28 = arith.cmpi sge, %24, %27 : vector<16x2xi32>
      %c8_i32_17 = arith.constant 8 : i32
      %29 = vector.broadcast %c8_i32_17 : i32 to vector<16x2xi32>
      %30 = arith.muli %25, %29 : vector<16x2xi32>
      %c8_i32_18 = arith.constant 8 : i32
      %31 = vector.broadcast %c8_i32_18 : i32 to vector<16x2xi32>
      %32 = arith.addi %30, %31 : vector<16x2xi32>
      %33 = arith.cmpi slt, %24, %32 : vector<16x2xi32>
      %34 = arith.andi %28, %33 : vector<16x2xi1>
      %cst_19 = arith.constant 1.000000e+00 : f32
      %cst_20 = arith.constant 0.000000e+00 : f32
      %35 = vector.broadcast %cst_19 : f32 to vector<16x2xf32>
      %36 = vector.broadcast %cst_20 : f32 to vector<16x2xf32>
      %37 = arith.select %34, %35, %36 : vector<16x2xi1>, vector<16x2xf32>
      %38 = arith.truncf %37 : vector<16x2xf32> to vector<16x2xbf16>
      %c0_21 = arith.constant 0 : index
      %c0_22 = arith.constant 0 : index
      %39 = vector.load %arg13[%c0_21, %c0_22] : memref<16x2xbf16, #tpu.memory_space<vmem>>, vector<16x2xbf16>
      tpu.vector_store %arg13[%c0_21, %c0_22], %38 {strides = array<i32>} : memref<16x2xbf16, #tpu.memory_space<vmem>>, vector<16x2xbf16>,
      %c0_23 = arith.constant 0 : index
      %c0_24 = arith.constant 0 : index
      %40 = vector.load %arg2[%c0_23, %c0_24] : memref<16x128xbf16, #tpu.memory_space<vmem>>, vector<16x128xbf16>
      %c0_25 = arith.constant 0 : index
      %c0_26 = arith.constant 0 : index
      %41 = vector.load %arg5[%c0_25, %c0_26] : memref<128x128xbf16, #tpu.memory_space<vmem>>, vector<128x128xbf16>
      %cst_27 = arith.constant dense<0.000000e+00> : vector<16x128xf32>
      %42 = tpu.matmul %40, %41, %cst_27 {dimension_numbers = #tpu.dot_dimension_numbers<[1], [0], [0], [1], [0, 0, 1, 1], [], []>} : vector<16x128xbf16>, vector<128x128xbf16>, vector<16x128xf32> -> vector<16x128xf32>
      %c0_28 = arith.constant 0 : index
      %c0_29 = arith.constant 0 : index
      %43 = vector.load %arg7[%c0_28, %c0_29] : memref<1x128xf32, #tpu.memory_space<vmem>>, vector<1x128xf32>
      %44 = vector.broadcast %43 : vector<1x128xf32> to vector<16x128xf32>
      %45 = arith.addf %42, %44 : vector<16x128xf32>
      %c0_30 = arith.constant 0 : index
      %c0_31 = arith.constant 0 : index
      %46 = vector.load %arg6[%c0_30, %c0_31] : memref<128x128xbf16, #tpu.memory_space<vmem>>, vector<128x128xbf16>
      %cst_32 = arith.constant dense<0.000000e+00> : vector<16x128xf32>
      %47 = tpu.matmul %40, %46, %cst_32 {dimension_numbers = #tpu.dot_dimension_numbers<[1], [0], [0], [1], [0, 0, 1, 1], [], []>} : vector<16x128xbf16>, vector<128x128xbf16>, vector<16x128xf32> -> vector<16x128xf32>
      %c0_33 = arith.constant 0 : index
      %c0_34 = arith.constant 0 : index
      %48 = vector.load %arg8[%c0_33, %c0_34] : memref<1x128xf32, #tpu.memory_space<vmem>>, vector<1x128xf32>
      %49 = vector.broadcast %48 : vector<1x128xf32> to vector<16x128xf32>
      %50 = arith.addf %47, %49 : vector<16x128xf32>
      %c0_35 = arith.constant 0 : index
      %c0_36 = arith.constant 0 : index
      %51 = vector.load %arg13[%c0_35, %c0_36] : memref<16x2xbf16, #tpu.memory_space<vmem>>, vector<16x2xbf16>
      %c0_37 = arith.constant 0 : index
      %c0_38 = arith.constant 0 : index
      %52 = vector.load %arg3[%c0_37, %c0_38] : memref<2x128xbf16, #tpu.memory_space<vmem>>, vector<2x128xbf16>
      %cst_39 = arith.constant dense<0.000000e+00> : vector<16x128xf32>
      %53 = tpu.matmul %51, %52, %cst_39 {dimension_numbers = #tpu.dot_dimension_numbers<[1], [0], [0], [1], [0, 0, 1, 1], [], []>} : vector<16x2xbf16>, vector<2x128xbf16>, vector<16x128xf32> -> vector<16x128xf32>
      %54 = arith.truncf %45 : vector<16x128xf32> to vector<16x128xbf16>
      %c0_40 = arith.constant 0 : index
      %c0_41 = arith.constant 0 : index
      %55 = vector.load %arg14[%c0_40, %c0_41] : memref<16x256xbf16, #tpu.memory_space<vmem>>, vector<16x128xbf16>
      tpu.vector_store %arg14[%c0_40, %c0_41], %54 {strides = array<i32>} : memref<16x256xbf16, #tpu.memory_space<vmem>>, vector<16x128xbf16>,
      %56 = arith.mulf %53, %50 : vector<16x128xf32>
      %57 = arith.truncf %56 : vector<16x128xf32> to vector<16x128xbf16>
      %c0_42 = arith.constant 0 : index
      %c128 = arith.constant 128 : index
      %58 = vector.load %arg14[%c0_42, %c128] : memref<16x256xbf16, #tpu.memory_space<vmem>>, vector<16x128xbf16>
      tpu.vector_store %arg14[%c0_42, %c128], %57 {strides = array<i32>} : memref<16x256xbf16, #tpu.memory_space<vmem>>, vector<16x128xbf16>,
      %cst_43 = arith.constant 0.000000e+00 : f32
      %59 = vector.broadcast %cst_43 : f32 to vector<16x128xf32>
      %c0_44 = arith.constant 0 : index
      %c0_45 = arith.constant 0 : index
      %60 = vector.load %arg15[%c0_44, %c0_45] : memref<16x128xf32, #tpu.memory_space<vmem>>, vector<16x128xf32>
      tpu.vector_store %arg15[%c0_44, %c0_45], %59 {strides = array<i32>} : memref<16x128xf32, #tpu.memory_space<vmem>>, vector<16x128xf32>,
    } else {
    }
    %c0 = arith.constant 0 : index
    %c0_1 = arith.constant 0 : index
    %3 = vector.load %arg13[%c0, %c0_1] : memref<16x2xbf16, #tpu.memory_space<vmem>>, vector<16x2xbf16>
    %c0_2 = arith.constant 0 : index
    %c0_3 = arith.constant 0 : index
    %4 = vector.load %arg4[%c0_2, %c0_3] : memref<2x256xbf16, #tpu.memory_space<vmem>>, vector<2x256xbf16>
    %cst = arith.constant dense<0.000000e+00> : vector<16x256xf32>
    %5 = tpu.matmul %3, %4, %cst {dimension_numbers = #tpu.dot_dimension_numbers<[1], [0], [0], [1], [0, 0, 1, 1], [], []>} : vector<16x2xbf16>, vector<2x256xbf16>, vector<16x256xf32> -> vector<16x256xf32>
    %c0_4 = arith.constant 0 : index
    %c0_5 = arith.constant 0 : index
    %6 = vector.load %arg14[%c0_4, %c0_5] : memref<16x256xbf16, #tpu.memory_space<vmem>>, vector<16x256xbf16>
    %c0_6 = arith.constant 0 : index
    %c0_7 = arith.constant 0 : index
    %7 = vector.load %arg9[%c0_6, %c0_7] : memref<256x256xbf16, #tpu.memory_space<vmem>>, vector<256x256xbf16>
    %cst_8 = arith.constant dense<0.000000e+00> : vector<16x256xf32>
    %8 = tpu.matmul %6, %7, %cst_8 {dimension_numbers = #tpu.dot_dimension_numbers<[1], [0], [0], [1], [0, 0, 1, 1], [], []>} : vector<16x256xbf16>, vector<256x256xbf16>, vector<16x256xf32> -> vector<16x256xf32>
    %9 = arith.addf %5, %8 : vector<16x256xf32>
    %cst_9 = arith.constant 0.000000e+00 : f32
    %10 = vector.broadcast %cst_9 : f32 to vector<16x256xf32>
    %11 = arith.maximumf %9, %10 : vector<16x256xf32>
    %c0_10 = arith.constant 0 : index
    %c0_11 = arith.constant 0 : index
    %12 = vector.load %arg10[%c0_10, %c0_11] : memref<1x256xf32, #tpu.memory_space<vmem>>, vector<1x256xf32>
    %13 = vector.broadcast %12 : vector<1x256xf32> to vector<16x256xf32>
    %14 = arith.mulf %11, %13 : vector<16x256xf32>
    %15 = vector.extract_strided_slice %14 {offsets = [0, 0], sizes = [16, 128], strides = [1, 1]} : vector<16x256xf32> to vector<16x128xf32>
    %16 = vector.extract_strided_slice %14 {offsets = [0, 128], sizes = [16, 128], strides = [1, 1]} : vector<16x256xf32> to vector<16x128xf32>
    %17 = arith.addf %15, %16 : vector<16x128xf32>
    %c0_12 = arith.constant 0 : index
    %c0_13 = arith.constant 0 : index
    %18 = vector.load %arg15[%c0_12, %c0_13] : memref<16x128xf32, #tpu.memory_space<vmem>>, vector<16x128xf32>
    %19 = arith.addf %18, %17 : vector<16x128xf32>
    %c0_14 = arith.constant 0 : index
    %c0_15 = arith.constant 0 : index
    %20 = vector.load %arg15[%c0_14, %c0_15] : memref<16x128xf32, #tpu.memory_space<vmem>>, vector<16x128xf32>
    tpu.vector_store %arg15[%c0_14, %c0_15], %19 {strides = array<i32>} : memref<16x128xf32, #tpu.memory_space<vmem>>, vector<16x128xf32>,
    %c1_i32 = arith.constant 1 : i32
    %21 = arith.cmpi eq, %arg1, %c1_i32 : i32
    %22 = arith.extui %21 : i1 to i32
    %c0_i32_16 = arith.constant 0 : i32
    %23 = arith.cmpi ne, %22, %c0_i32_16 : i32
    scf.if %23 {
      %c0_17 = arith.constant 0 : index
      %c0_18 = arith.constant 0 : index
      %24 = vector.load %arg15[%c0_17, %c0_18] : memref<16x128xf32, #tpu.memory_space<vmem>>, vector<16x128xf32>
      %cst_19 = arith.constant dense<0.000000e+00> : vector<16xf32>
      %25 = vector.multi_reduction <add>, %24, %cst_19 [1] : vector<16x128xf32> to vector<16xf32>
      %26 = vector.shape_cast %25 : vector<16xf32> to vector<16x1xf32>
      %27 = tpu.iota {dimensions = array<i32: 0>} : vector<2x16xi32>
      %28 = tpu.iota {dimensions = array<i32: 1>} : vector<2x16xi32>
      %c8_i32 = arith.constant 8 : i32
      %29 = vector.broadcast %c8_i32 : i32 to vector<2x16xi32>
      %30 = arith.muli %27, %29 : vector<2x16xi32>
      %31 = arith.cmpi sge, %28, %30 : vector<2x16xi32>
      %c8_i32_20 = arith.constant 8 : i32
      %32 = vector.broadcast %c8_i32_20 : i32 to vector<2x16xi32>
      %33 = arith.muli %27, %32 : vector<2x16xi32>
      %c8_i32_21 = arith.constant 8 : i32
      %34 = vector.broadcast %c8_i32_21 : i32 to vector<2x16xi32>
      %35 = arith.addi %33, %34 : vector<2x16xi32>
      %36 = arith.cmpi slt, %28, %35 : vector<2x16xi32>
      %37 = arith.andi %31, %36 : vector<2x16xi1>
      %cst_22 = arith.constant 1.000000e+00 : f32
      %cst_23 = arith.constant 0.000000e+00 : f32
      %38 = vector.broadcast %cst_22 : f32 to vector<2x16xf32>
      %39 = vector.broadcast %cst_23 : f32 to vector<2x16xf32>
      %40 = arith.select %37, %38, %39 : vector<2x16xi1>, vector<2x16xf32>
      %41 = tpu.iota {dimensions = array<i32: 0>} : vector<2x1xi32>
      %42 = arith.sitofp %41 : vector<2x1xi32> to vector<2x1xf32>
      %c0_24 = arith.constant 0 : index
      %c0_25 = arith.constant 0 : index
      %43 = vector.load %arg13[%c0_24, %c0_25] : memref<16x2xbf16, #tpu.memory_space<vmem>>, vector<16x2xbf16>
      %44 = arith.extf %43 : vector<16x2xbf16> to vector<16x2xf32>
      %cst_26 = arith.constant dense<0.000000e+00> : vector<16x1xf32>
      %45 = tpu.matmul %44, %42, %cst_26 {dimension_numbers = #tpu.dot_dimension_numbers<[1], [0], [0], [1], [0, 0, 1, 1], [], []>} : vector<16x2xf32>, vector<2x1xf32>, vector<16x1xf32> -> vector<16x1xf32>
      %46 = tpu.iota {dimensions = array<i32: 0>} : vector<16x1xi32>
      %47 = arith.sitofp %46 : vector<16x1xi32> to vector<16x1xf32>
      %cst_27 = arith.constant 8.000000e+00 : f32
      %48 = vector.broadcast %cst_27 : f32 to vector<16x1xf32>
      %49 = arith.mulf %48, %45 : vector<16x1xf32>
      %50 = arith.subf %47, %49 : vector<16x1xf32>
      %51 = tpu.iota {dimensions = array<i32: 1>} : vector<16x8xi32>
      %52 = arith.sitofp %51 : vector<16x8xi32> to vector<16x8xf32>
      %53 = vector.broadcast %50 : vector<16x1xf32> to vector<16x8xf32>
      %54 = arith.cmpf oeq, %53, %52 : vector<16x8xf32>
      %cst_28 = arith.constant 1.000000e+00 : f32
      %cst_29 = arith.constant 0.000000e+00 : f32
      %55 = vector.broadcast %cst_28 : f32 to vector<16x8xf32>
      %56 = vector.broadcast %cst_29 : f32 to vector<16x8xf32>
      %57 = arith.select %54, %55, %56 : vector<16x8xi1>, vector<16x8xf32>
      %58 = vector.broadcast %26 : vector<16x1xf32> to vector<16x8xf32>
      %59 = arith.mulf %58, %57 : vector<16x8xf32>
      %cst_30 = arith.constant dense<0.000000e+00> : vector<2x8xf32>
      %60 = tpu.matmul %40, %59, %cst_30 {dimension_numbers = #tpu.dot_dimension_numbers<[1], [0], [0], [1], [0, 0, 1, 1], [], []>} : vector<2x16xf32>, vector<16x8xf32>, vector<2x8xf32> -> vector<2x8xf32>
      %c0_31 = arith.constant 0 : index
      %c0_32 = arith.constant 0 : index
      %61 = vector.load %arg11[%c0_31, %c0_32] : memref<1x1xf32, #tpu.memory_space<vmem>>, vector<1x1xf32>
      %62 = vector.broadcast %61 : vector<1x1xf32> to vector<2x8xf32>
      %63 = arith.addf %60, %62 : vector<2x8xf32>
      %c0_33 = arith.constant 0 : index
      %c0_34 = arith.constant 0 : index
      %64 = vector.load %arg12[%c0_33, %c0_34] : memref<2x8xf32, #tpu.memory_space<vmem>>, vector<2x8xf32>
      tpu.vector_store %arg12[%c0_33, %c0_34], %63 {strides = array<i32>} : memref<2x8xf32, #tpu.memory_space<vmem>>, vector<2x8xf32>,
    } else {
    }
    return
  }
  func.func @transform_0(%arg0: i32, %arg1: i32) -> (i32, i32) {
    %c0_i32 = arith.constant 0 : i32
    %c0_i32_0 = arith.constant 0 : i32
    return %arg0, %c0_i32 : i32, i32
  }
  func.func @transform_1(%arg0: i32, %arg1: i32) -> (i32, i32) {
    %c0_i32 = arith.constant 0 : i32
    %c0_i32_0 = arith.constant 0 : i32
    return %arg0, %c0_i32 : i32, i32
  }
  func.func @transform_2(%arg0: i32, %arg1: i32) -> (i32, i32) {
    %c0_i32 = arith.constant 0 : i32
    return %arg0, %arg1 : i32, i32
  }
  func.func @transform_3(%arg0: i32, %arg1: i32) -> (i32, i32) {
    %c0_i32 = arith.constant 0 : i32
    %c0_i32_0 = arith.constant 0 : i32
    %c0_i32_1 = arith.constant 0 : i32
    return %c0_i32, %c0_i32_0 : i32, i32
  }
  func.func @transform_4(%arg0: i32, %arg1: i32) -> (i32, i32) {
    %c0_i32 = arith.constant 0 : i32
    %c0_i32_0 = arith.constant 0 : i32
    %c0_i32_1 = arith.constant 0 : i32
    return %c0_i32, %c0_i32_0 : i32, i32
  }
  func.func @transform_5(%arg0: i32, %arg1: i32) -> (i32, i32) {
    %c0_i32 = arith.constant 0 : i32
    %c0_i32_0 = arith.constant 0 : i32
    %c0_i32_1 = arith.constant 0 : i32
    return %c0_i32, %c0_i32_0 : i32, i32
  }
  func.func @transform_6(%arg0: i32, %arg1: i32) -> (i32, i32) {
    %c0_i32 = arith.constant 0 : i32
    %c0_i32_0 = arith.constant 0 : i32
    %c0_i32_1 = arith.constant 0 : i32
    return %c0_i32, %c0_i32_0 : i32, i32
  }
  func.func @transform_7(%arg0: i32, %arg1: i32) -> (i32, i32) {
    %c0_i32 = arith.constant 0 : i32
    %c0_i32_0 = arith.constant 0 : i32
    return %c0_i32, %arg1 : i32, i32
  }
  func.func @transform_8(%arg0: i32, %arg1: i32) -> (i32, i32) {
    %c0_i32 = arith.constant 0 : i32
    %c0_i32_0 = arith.constant 0 : i32
    return %c0_i32, %arg1 : i32, i32
  }
  func.func @transform_9(%arg0: i32, %arg1: i32) -> (i32, i32) {
    %c0_i32 = arith.constant 0 : i32
    %c0_i32_0 = arith.constant 0 : i32
    %c0_i32_1 = arith.constant 0 : i32
    return %c0_i32, %c0_i32_0 : i32, i32
  }
  func.func @transform_10(%arg0: i32, %arg1: i32) -> (i32, i32) {
    %c0_i32 = arith.constant 0 : i32
    %c0_i32_0 = arith.constant 0 : i32
    return %arg0, %c0_i32 : i32, i32
  }
}

</mosaic_0001>

<bundles_post_ra>
// kernel: tpu_custom_call.1
= control target key start
LH: loop header
LB: loop body
LE: loop exit
PB: predicated region body
PF: predicated region fallthrough
CT: control target
= control target key end

     0   :  { %s2477_s0 = inlined_call_operand.hbm [shape: bf16[16,128], index: 0, kind: input, shape index: {}]   ;;  %s2478_s1 = inlined_call_operand.vmem [shape: bf16[2,128], index: 1, kind: input, shape index: {}]   ;;  %s2479_s2 = inlined_call_operand.vmem [shape: bf16[2,512], index: 2, kind: input, shape index: {}]   ;;  %s2480_s3 = inlined_call_operand.hbm [shape: bf16[128,128], index: 3, kind: input, shape index: {}]   ;;  %s2481_s4 = inlined_call_operand.hbm [shape: bf16[128,128], index: 4, kind: input, shape index: {}]   ;;  %s2482_s5 = inlined_call_operand.vmem [shape: f32[1,128], index: 5, kind: input, shape index: {}]   ;;  %s2483_s6 = inlined_call_operand.vmem [shape: f32[1,128], index: 6, kind: input, shape index: {}]   ;;  %s2484_s7 = inlined_call_operand.hbm [shape: bf16[256,512], index: 7, kind: input, shape index: {}]   ;;  %s2485_s8 = inlined_call_operand.vmem [shape: f32[1,512], index: 8, kind: input, shape index: {}]   ;;  %s2486_s9 = inlined_call_operand.<no memory space> [shape: f32[1,1], index: 9, kind: input, shape index: {}]   ;;  %s2487_s10 = inlined_call_operand.hbm [shape: f32[2,8], index: 10, kind: output, shape index: {}]  }
   0x1   :  { %2490 = sst [smem:[#allocation19_spill]] %s2477_s0  ;;  %v15_v0 = vstv %s2486_s9 }
   0x2   :  { %2491 = sst [smem:[#allocation20_spill]] %s2480_s3  ;;  %16 = vst [vmem:[#allocation5] sm:$0x1] %v15_v0 }
   0x3   :  { %2492 = sst [smem:[#allocation21_spill]] %s2481_s4 }
   0x4   :  { %2493 = sst [smem:[#allocation22_spill]] %s2487_s10 }
   0x5   :  { %17 = vsyncpa [#allocation7], 0 }
   0x6   :  { %18 = vsyncpa [#allocation10], 0 }
   0x7   :  { %19 = vsyncpa [#allocation13], 0 }
   0x8   :  { %21 = vsyncpa [#allocation13 + $0x1], 0 }
   0x9   :  { %22 = vsyncpa [#allocation8], 0  ;;  %s2201_s15 = smov 0   ;;  %s2203_s16 = smov 0  }
   0xa   :  { %s2205_s17 = smov 0   ;;  %s2207_s18 = smov 0  }
   0xb   :  { %s2209_s19 = smov 0   ;;  %s2211_s20 = smov 0  }
   0xc LB: > { %s2489_s9 = sadd.s32 4294967295, %s2124_s20   ;;  %p218_p0 = scmp.ne.s32.totalorder %s2112_s17, %s2108_s16  ;;  %s2124_s20 = sphi %s2211_s20, %s28_s20   ;;  %s2120_s19 = sphi %s2209_s19, %s2510_s19   ;;  %s2116_s18 = sphi %s2207_s18, %s2509_s18   ;;  %s2112_s17 = sphi %s2205_s17, %s2508_s17   ;;  %s2108_s16 = sphi %s2203_s16, %s2507_s16   ;;  %s2104_s15 = sphi %s2201_s15, %s2506_s15  }
   0xd   : > { %p219_p1 = scmp.eq.s32.totalorder %s2124_s20, 0  ;;  %p224_p2 = scmp.ne.s32.totalorder %s2108_s16, %s2104_s15 }
   0xe   : > { %p2236_p3 = scmp.eq.s32.totalorder %s2489_s9, 0  ;;  %p1568_p4 = scmp.ge.s32.totalorder %s2124_s20, 1 }
   0xf   : > { %p220_p5 = por %p219_p1, %p218_p0  ;;  %p308_p6 = scmp.lt.s32.totalorder %s2124_s20, 3 }
  0x10   : > { %p2244_p7 = por %p2236_p3, %p224_p2  ;;  %s2126_s24 = smov [#allocation9]  }
  0x11   : > { %p2248_p8 = pnand %p1568_p4, %p308_p6  ;;  %s342_s25 = sshll.u32 %s2126_s24, 4  ;;  %s343_s25 = int_to_ptr.vmem [resolvable:$true] %s342_s25 }
  0x12   : > { %s2495_s22 = scalar_select %p2244_p7, 1, 0 }
  0x13   : > { %p1773_p9 = pneg %p2248_p8  ;;  %p1790_p11 = scmp.lt.s32.totalorder %s2124_s20, 2 }
  0x14   : > { %s1943_s28 = scalar_lea.vmem %s343_s25, 1024  ;;  %p1951_p4 = scmp.lt.s32.totalorder %s343_s25, %s343_s25 }
  0x15   : > { %p2256_p10 = pnand %p1773_p9, %p2236_p3  ;;  %p2261_p12 = pnand %p1790_p11, %p220_p5 }
  0x16   : > { %p1944_p0 = scmp.ne.s32.totalorder %s343_s25, %s1943_s28  ;;  %p1952_p6 = scmp.lt.s32.totalorder %s1943_s28, %s1943_s28 }
  0x17   : > { %p1934_p13 = pneg %p2256_p10 }
  0x18   : > { %p1953_p9 = por %p1952_p6, %p1951_p4 }
  0x19   : > { %p1946_p1 = pnand %p1944_p0, %p1934_p13 }
  0x1b   : > { %p1947_p2 = pneg %p1946_p1 }
  0x1d   : > { %p1954_p7 = pnand %p1953_p9, %p1947_p2 }
  0x1f   : > { %1957 = shalt.err (!%p1954_p7)
}
  0x20   : > { %s2127_s29 = smov 64   ;;  %s2128_s30 = smov 4  }
  0x21   : > { %s2499_s3 = sld [smem:[#allocation20_spill]]  ;;  %s2129_s13 = smov [#allocation6]  }
  0x22   : > { %s323_s14 = sshll.u32 %s2129_s13, 4  ;;  %s2130_s15 = smov [#allocation11]   ;;  %s324_s14 = int_to_ptr.vmem [resolvable:$true] %s323_s14 }
  0x23   : > { %s355_s24 = sshll.u32 %s2130_s15, 4  ;;  %s1969_s28 = scalar_lea.vmem %s324_s14, 128  ;;  %s356_s24 = int_to_ptr.vmem [resolvable:$true] %s355_s24 }
  0x24   : > { %p1970_p5 = scmp.ne.s32.totalorder %s324_s14, %s1969_s28  ;;  %p1977_p0 = scmp.lt.s32.totalorder %s324_s14, %s324_s14 }
  0x25   : > { %p1978_p1 = scmp.lt.s32.totalorder %s1969_s28, %s1969_s28 }
  0x26   : > { %p1972_p7 = pnand %p1970_p5, %p1934_p13 }
  0x27   : > { %1779 = dma.hbm_to_vmem [thread:$0]  (!%p2256_p10), %s2499_s3, 1024, %s343_s25, [#allocation10], %s2127_s29, %s2127_s29, %s2128_s30  }
  0x28   : > { %p1973_p11 = pneg %p1972_p7  ;;  %p1979_p2 = por %p1978_p1, %p1977_p0 }
  0x2a   : > { %p1980_p4 = pnand %p1979_p2, %p1973_p11 }
  0x2c   : > { %1983 = shalt.err (!%p1980_p4)
}
  0x2d   : > { %s2500_s0 = sld [smem:[#allocation19_spill]]  ;;  %s1995_s12 = scalar_lea.vmem %s356_s24, 1024 }
  0x2e   : > { %p1996_p6 = scmp.ne.s32.totalorder %s356_s24, %s1995_s12  ;;  %p2003_p7 = scmp.lt.s32.totalorder %s356_s24, %s356_s24 }
  0x2f   : > { %p2004_p11 = scmp.lt.s32.totalorder %s1995_s12, %s1995_s12 }
  0x30   : > { %p1998_p9 = pnand %p1996_p6, %p1934_p13 }
  0x31   : > { %p2005_p0 = por %p2004_p11, %p2003_p7 }
  0x32   : > { %p1999_p5 = pneg %p1998_p9 }
  0x33   : > { %1776 = dma.hbm_to_vmem [thread:$0]  (!%p2256_p10), %s2500_s0, 128, %s324_s14, [#allocation7], %s2127_s29, %s2127_s29, %s2128_s30  }
  0x34   : > { %p2006_p1 = pnand %p2005_p0, %p1999_p5 }
  0x36   : > { %2009 = shalt.err (!%p2006_p1)
}
  0x37   : > { %s2501_s4 = sld [smem:[#allocation21_spill]]  ;;  %s211_s14 = sadd.s32 1, %s2112_s17 }
  0x38   : > { %s37_s28 = sadd.s32 1, %s2120_s19  ;;  %s390_s25 = sand.u32 1, %s2112_s17  }
  0x39   : > { %p38_p13 = scmp.ge.s32.totalorder %s37_s28, 2  ;;  %s1574_s11 = sshll.u32 %s390_s25, 8 }
  0x3a   : > { %s1660_s26 = sshll.u32 %s2120_s19, 7  ;;  %s394_s0 = scalar_lea.vmem [#allocation12], %s1574_s11 }
  0x3b   : > { %s2512_s28 = smov (%p38_p13, %s37_s28), 0  ;;  %s2309_s13 = scalar_lea.hbm %s2484_s7, %s1660_s26 }
  0x3c   : > { %s208_s15 = ssub.s32 %s2120_s19, %s2512_s28  ;;  %s401_s3 = sshll.u32 %s394_s0, 4  ;;  %s402_s3 = int_to_ptr.vmem [resolvable:$true] %s401_s3 }
  0x3d   : > { %1782 = dma.hbm_to_vmem [thread:$0]  (!%p2256_p10), %s2501_s4, 1024, %s356_s24, [#allocation10], %s2127_s29, %s2127_s29, %s2128_s30  }
  0x3e   : > { %p209_p2 = scmp.eq.s32.totalorder %s208_s15, 0  ;;  %s391_s30 = scalar_lea.sflag [#allocation13], %s390_s25 }
  0x3f   : > { %p2012_p10 = pneg %p2261_p12  ;;  %s2023_s24 = scalar_lea.vmem %s402_s3, 4096 }
  0x40   : > { %s2314_s29 = scalar_select %p209_p2, %s2112_s17, %s211_s14  }
  0x41   : > { %p2024_p4 = scmp.ne.s32.totalorder %s402_s3, %s2023_s24  ;;  %s2131_s4 = smov [#allocation12]  }
  0x42   : > { %s2028_s10 = sshll.u32 %s2131_s4, 4  ;;  %s2029_s10 = int_to_ptr.vmem [resolvable:$false] %s2028_s10 }
  0x43   : > { %p2026_p6 = pnand %p2024_p4, %p2012_p10  ;;  %s2030_s9 = scalar_lea.vmem %s2029_s10, 8192 }
  0x44   : > { %p2031_p5 = scmp.lt.s32.totalorder %s402_s3, %s2029_s10  ;;  %p2032_p7 = scmp.lt.s32.totalorder %s2030_s9, %s2023_s24 }
  0x45   : > { %p2027_p9 = pneg %p2026_p6 }
  0x46   : > { %p2033_p11 = por %p2032_p7, %p2031_p5 }
  0x48   : > { %p2034_p0 = pnand %p2033_p11, %p2027_p9 }
  0x4a   : > { %2037 = shalt.err (!%p2034_p0)
}
  0x4b   : > { %s2132_s0 = smov 256   ;;  %s2133_s14 = smov 128  }
  0x4c   : > { %s2134_s25 = smov 8   ;;  %421 = sbr.rel (%p2248_p8) target bundleno = 1164 (0x48c), region = 60 }
  0x4d   : > { %1786 = dma.hbm_to_vmem [thread:$0]  (!%p2261_p12), %s2309_s13, 4096, %s402_s3, %s391_s30, %s2132_s0, %s2133_s14, %s2134_s25  }
  0x51   : > { %2087 = dma.done.wait (%p2236_p3), [#allocation7], 128  }
  0x52   : > { %2089 = vsyncadd (%p2236_p3), [#allocation7], 4294967168 }
  0x53   : > { %2091 = dma.done.wait (%p2236_p3), [#allocation10], 2048  }
  0x54   : > { %2093 = vsyncadd (%p2236_p3), [#allocation10], 4294965248  ;;  %s435_s4 = sand.u32 1, %s2108_s16   ;;  %p2502_p8 = scmp.ne.s32.totalorder %s2495_s22, 0 }
  0x55   : > { %s1581_s10 = sshll.u32 %s435_s4, 8  ;;  %s436_s3 = scalar_lea.sflag [#allocation13], %s435_s4 }
  0x56   : > { %s2332_s27 = scalar_lea.vmem [#allocation12], %s1581_s10 }
  0x57   : > { %2095 = dma.done.wait (%p2502_p8), %s436_s3, 4096  }
  0x58   : > { %2097 = vsyncadd (%p2502_p8), %s436_s3, 4294963200  ;;  %s1582_s23 = sshll.u32 %s2116_s18, 1  ;;  %p1584_p3 = scmp.ne.s32.totalorder %s2116_s18, 0 }
  0x59   : > { %p493_p12 = scmp.lt.s32.totalorder %s1582_s23, 3 }
  0x5a   : > { %509 = sbr.rel (%p1584_p3) target bundleno = 338 (0x152), region = 80 }
  0x5b   : > { %s2514_s23 = smov (!%p493_p12, %s1582_s23), 3 }
  0x5c   : > { %s497_s26 = scalar_lea.vmem %s2479_s2, %s2514_s23  ;;  %s503_s15 = scalar_lea.vmem %s2485_s8, %s2514_s23 }
  0x5f   : > { %v1860_v1 = vld [vmem:[#allocation9 + $0x38] sm:$0xff]   ;;  %v510_v2 = vlaneseq  ;;  %v2135_v3 = vmov 0.0   ;;  %v1862_v5 = vld [vmem:[#allocation9 + $0x30] sm:$0xff]   ;;  %vm2136_vm0 = vmmov 0   ;;  %v1864_v8 = vld [vmem:[#allocation9 + $0x28] sm:$0xff]   ;;  %vm533_vm7 = vcmask 11264  }
  0x60   : > { %1697 = vmatprep.subr.bf16.mxu0 %v2135_v3  ;;  %847 = vst [vmem:[#allocation4] sm:$0xff] %v2135_v3  ;;  %848 = vst [vmem:[#allocation4 + $0x8] sm:$0xff] %v2135_v3  ;;  %1717 = vmatprep.subr.bf16.mxu1 %v2135_v3  ;;  %v1861_v4 = vld [vmem:[#allocation11 + $0x38] sm:$0xff]   ;;  %v1863_v6 = vld [vmem:[#allocation11 + $0x30] sm:$0xff]   ;;  %vm780_vm8 = vcmask 1040384   ;;  %vm776_vm9 = vcmask 15360  }
  0x61   : > { %1698 = vmatpush3.bf16.msra.mxu0 %v1860_v1  ;;  %1713 = vmatprep.mubr.msk.bf16.mxu0 %vm2136_vm0, %v2135_v3  ;;  %v514_v7 = vand.u32 127, %v510_v2  ;;  %v1865_v10 = vld [vmem:[#allocation11 + $0x28] sm:$0xff]   ;;  %v511_v11 = vshrl.u32 %v510_v2, 7  ;;  %v1866_v12 = vld [vmem:[#allocation9 + $0x20] sm:$0xff]   ;;  %v1868_v16 = vld [vmem:[#allocation9 + $0x18] sm:$0xff]  }
  0x62   : > { %1718 = vmatpush3.bf16.msra.mxu1 %v1861_v4  ;;  %1699 = vmatprep.subr.bf16.mxu0 %v2135_v3  ;;  %v1867_v14 = vld [vmem:[#allocation11 + $0x20] sm:$0xff]   ;;  %v1869_v17 = vld [vmem:[#allocation11 + $0x18] sm:$0xff]   ;;  %v1870_v18 = vld [vmem:[#allocation9 + $0x10] sm:$0xff]  }
  0x63   : > { %1719 = vmatprep.subr.bf16.mxu1 %v2135_v3  ;;  %1733 = vmatprep.mubr.msk.bf16.mxu1 %vm2136_vm0, %v2135_v3  ;;  %v515_v9 = vmul.u32 8, %v514_v7  ;;  %v512_v15 = vadd.s32 8, %v511_v11  ;;  %v1871_v20 = vld [vmem:[#allocation11 + $0x10] sm:$0xff]   ;;  %v1872_v24 = vld [vmem:[#allocation9 + $0x8] sm:$0xff]   ;;  %v1874_v26 = vld [vmem:[#allocation9] sm:$0xff]  }
  0x64   : > { %v1873_v25 = vld [vmem:[#allocation11 + $0x8] sm:$0xff]   ;;  %v1875_v27 = vld [vmem:[#allocation11] sm:$0xff]   ;;  %v1876_v29 = vld [vmem:[#allocation6] sm:$0xff]  }
  0x65   : > { %1700 = vmatpush3.bf16.msra.mxu0 %v1862_v5  ;;  %v518_v13 = vadd.s32 8, %v515_v9  ;;  %vm516_vm1 = vcmp.ge.s32.totalorder %v511_v11, %v515_v9  ;;  %vm517_vm3 = vcmp.ge.s32.totalorder %v512_v15, %v515_v9  ;;  %v770_v28 = vld [vmem:[%s2478_s1] sm:$0x1] }
  0x66   : > { %1720 = vmatpush3.bf16.msra.mxu1 %v1863_v6  ;;  %1701 = vmatprep.subr.bf16.mxu0 %v2135_v3  ;;  %v782_v30 = vsel %vm780_vm8, %v770_v28, 0  ;;  %v1587_v32 = vld [vmem:[%s2482_s5] ss:$0 sm:$0xff] }
  0x67   : > { %1721 = vmatprep.subr.bf16.mxu1 %v2135_v3  ;;  %vm519_vm2 = vcmp.lt.s32.totalorder %v511_v11, %v518_v13  ;;  %vm520_vm4 = vcmp.lt.s32.totalorder %v512_v15, %v518_v13  ;;  %v1597_v36 = vld [vmem:[%s2483_s6] ss:$0 sm:$0xff] }
  0x68   : > { %vm521_vm5 = vmand %vm516_vm1, %vm519_vm2 }
  0x69   : > { %1702 = vmatpush3.bf16.msra.mxu0 %v1864_v8  ;;  %vm522_vm6 = vmand %vm517_vm3, %vm520_vm4  ;;  %v523_v19 = vsel %vm521_vm5, 1.0, %v2135_v3 }
  0x6a   : > { %1722 = vmatpush3.bf16.msra.mxu1 %v1865_v10  ;;  %1703 = vmatprep.subr.bf16.mxu0 %v2135_v3  ;;  %v524_v21 = vsel %vm522_vm6, 1.0, %v2135_v3  ;;  %v1661_v22 = vpack.c.bf16 %v523_v19, %v523_v19 }
  0x6b   : > { %1723 = vmatprep.subr.bf16.mxu1 %v2135_v3  ;;  %v1662_v23 = vpack.c.bf16 %v524_v21, %v524_v21 }
  0x6c   : > { %534 = vst.msk [vmem:[#allocation2] sm:$0xf] %vm533_vm7, %v1661_v22 }
  0x6d   : > { %1704 = vmatpush3.bf16.msra.mxu0 %v1866_v12  ;;  %535 = vst.msk [vmem:[#allocation2 + $0x4] sm:$0xf] %vm533_vm7, %v1662_v23 }
  0x6e   : > { %1724 = vmatpush3.bf16.msra.mxu1 %v1867_v14  ;;  %1705 = vmatprep.subr.bf16.mxu0 %v2135_v3 }
  0x6f   : > { %1725 = vmatprep.subr.bf16.mxu1 %v2135_v3 }
  0x71   : > { %1706 = vmatpush3.bf16.msra.mxu0 %v1868_v16 }
  0x72   : > { %1726 = vmatpush3.bf16.msra.mxu1 %v1869_v17  ;;  %1707 = vmatprep.subr.bf16.mxu0 %v2135_v3 }
  0x73   : > { %1727 = vmatprep.subr.bf16.mxu1 %v2135_v3 }
  0x74   : > { %v1877_v31 = vld [vmem:[#allocation2] sm:$0xff]  }
  0x75   : > { %1708 = vmatpush3.bf16.msra.mxu0 %v1870_v18 }
  0x76   : > { %1728 = vmatpush3.bf16.msra.mxu1 %v1871_v20  ;;  %1709 = vmatprep.subr.bf16.mxu0 %v2135_v3 }
  0x77   : > { %1729 = vmatprep.subr.bf16.mxu1 %v2135_v3 }
  0x79   : > { %1710 = vmatpush3.bf16.msra.mxu0 %v1872_v24 }
  0x7a   : > { %1730 = vmatpush3.bf16.msra.mxu1 %v1873_v25  ;;  %1711 = vmatprep.subr.bf16.mxu0 %v2135_v3 }
  0x7b   : > { %1731 = vmatprep.subr.bf16.mxu1 %v2135_v3 }
  0x7d   : > { %1712 = vmatpush3.bf16.msra.mxu0 %v1874_v26 }
  0x7e   : > { %1732 = vmatpush3.bf16.msra.mxu1 %v1875_v27  ;;  %1737 = vmatprep.subr.bf16.mxu0 %v2135_v3 }
  0x80   : > { %1714 = vmatmul.mubr.bf16.vlgmr.msra.gmra.mxu0 %v1876_v29 }
  0x81   : > { %1734 = vmatmul.mubr.bf16.vlgmr.msra.gmra.mxu1 %v1876_v29  ;;  %1738 = vmatpush3.bf16.msra.mxu0 %v782_v30 }
  0x82   : > { %1739 = vmatprep.mubr.msk.bf16.mxu0 %vm2136_vm0, %v2135_v3 }
  0x88   : > { %1740 = vmatmul.mubr.msk.bf16.vlgmr.msra.gmra.mxu0 %vm776_vm9, %v1877_v31 }
 0x140   : > { %v649_v33 = vpop.f32.mrf.mxu0 }
 0x141   : > { %v650_v34 = vadd.f32 %v1587_v32, %v649_v33  ;;  %v761_v35 = vpop.f32.mrf.mxu1 }
 0x142   : > { %v1715_v37 = vpop.f32.mrf.mxu0  ;;  %v762_v41 = vadd.f32 %v1597_v36, %v761_v35 }
 0x143   : > { %v1663_v38 = vpack.c.bf16 %v650_v34, %v650_v34  ;;  %v1735_v39 = vpop.f32.mrf.mxu1 }
 0x144   : > { %v652_v40 = vpop.f32.mrf.mxu0 }
 0x145   : > { %833 = vst [vmem:[#allocation3] sm:$0xf] %v1663_v38  ;;  %v653_v42 = vadd.f32 %v1587_v32, %v652_v40  ;;  %v764_v43 = vpop.f32.mrf.mxu1 }
 0x146   : > { %v1716_v44 = vpop.f32.mrf.mxu0  ;;  %v765_v50 = vadd.f32 %v1597_v36, %v764_v43 }
 0x147   : > { %v1664_v45 = vpack.c.bf16 %v653_v42, %v653_v42  ;;  %v1736_v46 = vpop.f32.mrf.mxu1 }
 0x148   : > { %v818_v47 = vpop.f32.mrf.mxu0 }
 0x149   : > { %834 = vst [vmem:[#allocation3 + $0x8] sm:$0xf] %v1664_v45  ;;  %v835_v48 = vmul.f32 %v818_v47, %v762_v41 }
 0x14a   : > { %v1741_v49 = vpop.f32.mrf.mxu0 }
 0x14b   : > { %v1665_v51 = vpack.c.bf16 %v835_v48, %v835_v48 }
 0x14c   : > { %v821_v52 = vpop.f32.mrf.mxu0 }
 0x14d   : > { %845 = vst [vmem:[#allocation3 + $0x4] sm:$0xf] %v1665_v51  ;;  %v836_v53 = vmul.f32 %v821_v52, %v765_v50 }
 0x14e   : > { %v1742_v54 = vpop.f32.mrf.mxu0 }
 0x14f   : > { %v1666_v55 = vpack.c.bf16 %v836_v53, %v836_v53 }
 0x151   : > { %846 = vst [vmem:[#allocation3 + $0xc] sm:$0xf] %v1666_v55 }
 0x152 PF: > { %v1878_v56 = vld [vmem:[%s2332_s27 + $0x74] ss:$8 sps:$4 sm:$0xff]   ;;  %v1880_v57 = vld [vmem:[%s2332_s27 + $0x70] ss:$8 sps:$4 sm:$0xff]   ;;  %v1881_v58 = vld [vmem:[%s2332_s27 + $0x64] ss:$8 sps:$4 sm:$0xff]   ;;  %v1116_v2 = vlaneseq }
 0x153   : > { %1056 = vmatprep.subr.bf16.mxu0 %v1878_v56  ;;  %v2137_v59 = vmov 0   ;;  %v1883_v60 = vld [vmem:[%s2332_s27 + $0x60] ss:$8 sps:$4 sm:$0xff]   ;;  %v1884_v61 = vld [vmem:[%s2332_s27 + $0x54] ss:$8 sps:$4 sm:$0xff]   ;;  %vm1131_vm10 = vcmask 1040384  }
 0x154   : > { %1170 = vmatprep.mubr.bf16.mxu1 %v2137_v59  ;;  %1057 = vmatpush1.bf16.msra.mxu0 %v1880_v57  ;;  %v1886_v62 = vld [vmem:[%s2332_s27 + $0x50] ss:$8 sps:$4 sm:$0xff]   ;;  %v1887_v63 = vld [vmem:[%s2332_s27 + $0x44] ss:$8 sps:$4 sm:$0xff]   ;;  %v2138_v0 = vmov 1966171168  }
 0x155   : > { %1058 = vmatprep.subr.bf16.mxu0 %v1881_v58  ;;  %v1114_v1 = vunpack.c.l.s4 %v2138_v0  ;;  %v1889_v3 = vld [vmem:[%s2332_s27 + $0x40] ss:$8 sps:$4 sm:$0xff]   ;;  %v1890_v4 = vld [vmem:[%s2332_s27 + $0x34] ss:$8 sps:$4 sm:$0xff]   ;;  %v2396_v6 = vshrl.u32 %v1116_v2, 7  ;;  %vm1127_vm11 = vcmask 15360  }
 0x156   : > { %v1892_v7 = vld [vmem:[%s2332_s27 + $0x30] ss:$8 sps:$4 sm:$0xff]   ;;  %v1893_v8 = vld [vmem:[%s2332_s27 + $0x24] ss:$8 sps:$4 sm:$0xff]   ;;  %v1895_v10 = vld [vmem:[%s2332_s27 + $0x20] ss:$8 sps:$4 sm:$0xff]  }
 0x157   : > { %v1115_v5 = vunpack.c.0.s8 %v1114_v1  ;;  %v1647_v11 = vld.sshfl [vmem:[%s497_s26] sm:$0x11 pattern:$0x75316420]  ;;  %v1896_v12 = vld [vmem:[%s2332_s27 + $0x14] ss:$8 sps:$4 sm:$0xff]  }
 0x158   : > { %1059 = vmatpush1.bf16.msra.mxu0 %v1883_v60  ;;  %v1112_v13 = vcombine.high %v1647_v11, %v1647_v11  ;;  %v1898_v17 = vld [vmem:[%s2332_s27 + $0x10] ss:$8 sps:$4 sm:$0xff]   ;;  %v1899_v19 = vld [vmem:[%s2332_s27 + $0x4] ss:$8 sps:$4 sm:$0xff]   ;;  %v1901_v21 = vld [vmem:[%s2332_s27] ss:$8 sps:$4 sm:$0xff]  }
 0x159   : > { %1060 = vmatprep.subr.bf16.mxu0 %v1884_v61  ;;  %v1118_v9 = vsub.s32 %v1115_v5, %v2396_v6  ;;  %v1929_v18 = vld [vmem:[#allocation3 + $0x4] ss:$8 sps:$4 sm:$0xff]   ;;  %v1923_v20 = vld [vmem:[#allocation2] sm:$0xff]   ;;  %v1927_v38 = vld [vmem:[#allocation3] ss:$8 sps:$4 sm:$0xff]   ;;  %v1189_v41 = vsub.s32 0, %v2396_v6 }
 0x15a   : > { %1088 = vmatprep.mubr.bf16.mxu0 %v1929_v18  ;;  %v1902_v22 = vld [vmem:[%s2332_s27 + $0xf4] ss:$8 sps:$4 sm:$0xff]   ;;  %v1904_v23 = vld [vmem:[%s2332_s27 + $0xf0] ss:$8 sps:$4 sm:$0xff]   ;;  %v1905_v24 = vld [vmem:[%s2332_s27 + $0xe4] ss:$8 sps:$4 sm:$0xff]  }
 0x15b   : > { %v1119_v14 = vrot.slane %v1647_v11, %v1118_v9  ;;  %v1126_v15 = vrot.slane %v1112_v13, %v1118_v9  ;;  %v1907_v25 = vld [vmem:[%s2332_s27 + $0xe0] ss:$8 sps:$4 sm:$0xff]   ;;  %v1908_v26 = vld [vmem:[%s2332_s27 + $0xd4] ss:$8 sps:$4 sm:$0xff]   ;;  %v1910_v27 = vld [vmem:[%s2332_s27 + $0xd0] ss:$8 sps:$4 sm:$0xff]  }
 0x15c   : > { %1061 = vmatpush1.bf16.msra.mxu0 %v1886_v62  ;;  %v1911_v28 = vld [vmem:[%s2332_s27 + $0xc4] ss:$8 sps:$4 sm:$0xff]   ;;  %v1913_v29 = vld [vmem:[%s2332_s27 + $0xc0] ss:$8 sps:$4 sm:$0xff]   ;;  %v1914_v30 = vld [vmem:[%s2332_s27 + $0xb4] ss:$8 sps:$4 sm:$0xff]  }
 0x15d   : > { %1062 = vmatprep.subr.bf16.mxu0 %v1887_v63  ;;  %v1133_v16 = vsel %vm1131_vm10, %v1119_v14, 0  ;;  %1648 = vmatprep.subr.msk.bf16.mxu1 %vm1131_vm10, %v1126_v15  ;;  %v1916_v31 = vld [vmem:[%s2332_s27 + $0xb0] ss:$8 sps:$4 sm:$0xff]   ;;  %v1917_v32 = vld [vmem:[%s2332_s27 + $0xa4] ss:$8 sps:$4 sm:$0xff]   ;;  %v1193_v42 = vsub.s32 1, %v2396_v6 }
 0x15e   : > { %1153 = vmatpush1.bf16.msra.mxu1 %v1133_v16  ;;  %v1919_v33 = vld [vmem:[%s2332_s27 + $0xa0] ss:$8 sps:$4 sm:$0xff]   ;;  %v1920_v34 = vld [vmem:[%s2332_s27 + $0x94] ss:$8 sps:$4 sm:$0xff]   ;;  %v1922_v35 = vld [vmem:[%s2332_s27 + $0x90] ss:$8 sps:$4 sm:$0xff]  }
 0x15f   : > { %v1924_v36 = vld [vmem:[%s2332_s27 + $0x84] ss:$8 sps:$4 sm:$0xff]   ;;  %v1926_v37 = vld [vmem:[%s2332_s27 + $0x80] ss:$8 sps:$4 sm:$0xff]   ;;  %p1650_p1 = scmp.ne.s32.totalorder %s2116_s18, 1 }
 0x160   : > { %1063 = vmatpush1.bf16.msra.mxu0 %v1889_v3  ;;  %v1185_v44 = vld [vmem:[%s503_s15] sm:$0x3]  ;;  %v1203_v61 = vld [vmem:[#allocation4] sm:$0xff] }
 0x161   : > { %1064 = vmatprep.subr.bf16.mxu0 %v1890_v4  ;;  %1649 = vmatmul.mubr.msk.bf16.vlgmr.msra.gmra.mxu1 %vm1127_vm11, %v1923_v20  ;;  %v1190_v49 = vrot.slane %v1185_v44, %v1189_v41  ;;  %v1194_v51 = vrot.slane %v1185_v44, %v1193_v42  ;;  %v1204_v4 = vld [vmem:[#allocation4 + $0x8] sm:$0xff] }
 0x164   : > { %1065 = vmatpush1.bf16.msra.mxu0 %v1892_v7 }
 0x165   : > { %1066 = vmatprep.subr.bf16.mxu0 %v1893_v8 }
 0x168   : > { %1067 = vmatpush1.bf16.msra.mxu0 %v1895_v10 }
 0x169   : > { %1068 = vmatprep.subr.bf16.mxu0 %v1896_v12 }
 0x16c   : > { %1069 = vmatpush1.bf16.msra.mxu0 %v1898_v17 }
 0x16d   : > { %1070 = vmatprep.subr.bf16.mxu0 %v1899_v19 }
 0x170   : > { %1071 = vmatpush1.bf16.msra.mxu0 %v1901_v21 }
 0x171   : > { %1072 = vmatprep.subr.bf16.mxu0 %v1902_v22 }
 0x174   : > { %1073 = vmatpush2.bf16.msra.mxu0 %v1904_v23 }
 0x175   : > { %1074 = vmatprep.subr.bf16.mxu0 %v1905_v24 }
 0x178   : > { %1075 = vmatpush2.bf16.msra.mxu0 %v1907_v25 }
 0x179   : > { %1076 = vmatprep.subr.bf16.mxu0 %v1908_v26 }
 0x17c   : > { %1077 = vmatpush2.bf16.msra.mxu0 %v1910_v27 }
 0x17d   : > { %1078 = vmatprep.subr.bf16.mxu0 %v1911_v28 }
 0x180   : > { %1079 = vmatpush2.bf16.msra.mxu0 %v1913_v29 }
 0x181   : > { %1080 = vmatprep.subr.bf16.mxu0 %v1914_v30 }
 0x184   : > { %1081 = vmatpush2.bf16.msra.mxu0 %v1916_v31 }
 0x185   : > { %1082 = vmatprep.subr.bf16.mxu0 %v1917_v32 }
 0x188   : > { %1083 = vmatpush2.bf16.msra.mxu0 %v1919_v33 }
 0x189   : > { %1084 = vmatprep.subr.bf16.mxu0 %v1920_v34 }
 0x18c   : > { %1085 = vmatpush2.bf16.msra.mxu0 %v1922_v35 }
 0x18d   : > { %1086 = vmatprep.subr.bf16.mxu0 %v1924_v36 }
 0x190   : > { %1087 = vmatpush2.bf16.msra.mxu0 %v1926_v37 }
 0x193   : > { %1089 = vmatmul.mubr.bf16.vlgmr.msra.gmra.mxu0 %v1927_v38 }
 0x221   : > { %v1172_v39 = vpop.f32.mrf.mxu1 }
 0x223   : > { %v1174_v40 = vpop.f32.mrf.mxu1 }
 0x225   : > { %v1176_v46 = vpop.f32.mrf.mxu1 }
 0x227   : > { %v1178_v55 = vpop.f32.mrf.mxu1 }
 0x253   : > { %v1090_v43 = vpop.f32.mrf.mxu0 }
 0x254   : > { %v1173_v45 = vadd.f32 %v1172_v39, %v1090_v43 }
 0x255   : > { %v1092_v47 = vpop.f32.mrf.mxu0 }
 0x256   : > { %v1181_v48 = vmax.f32 %v1173_v45, 0.0  ;;  %v1175_v50 = vadd.f32 %v1174_v40, %v1092_v47 }
 0x257   : > { %v1094_v52 = vpop.f32.mrf.mxu0 }
 0x258   : > { %v1182_v53 = vmax.f32 %v1175_v50, 0.0  ;;  %v1177_v54 = vadd.f32 %v1176_v46, %v1094_v52  ;;  %v1197_v57 = vmul.f32 %v1190_v49, %v1181_v48 }
 0x259   : > { %v1096_v56 = vpop.f32.mrf.mxu0 }
 0x25a   : > { %v1198_v58 = vmul.f32 %v1194_v51, %v1182_v53  ;;  %v1183_v59 = vmax.f32 %v1177_v54, 0.0  ;;  %v1179_v60 = vadd.f32 %v1178_v55, %v1096_v56 }
 0x25c   : > { %v1201_v62 = vadd.f32 %v1198_v58, %v1197_v57  ;;  %v1184_v63 = vmax.f32 %v1179_v60, 0.0  ;;  %v1199_v1 = vmul.f32 %v1190_v49, %v1183_v59 }
 0x25e   : > { %v1205_v0 = vadd.f32 %v1203_v61, %v1201_v62  ;;  %v1200_v3 = vmul.f32 %v1194_v51, %v1184_v63 }
 0x260   : > { %1207 = vst [vmem:[#allocation4] sm:$0xff] %v1205_v0  ;;  %v1202_v5 = vadd.f32 %v1200_v3, %v1199_v1  ;;  %1212 = sbr.rel (%p1650_p1) target bundleno = 1143 (0x477), region = 84 }
 0x262   : > { %v1206_v7 = vadd.f32 %v1204_v4, %v1202_v5 }
 0x264   : > { %1208 = vst [vmem:[#allocation4 + $0x8] sm:$0xff] %v1206_v7 }
 0x265   : > { %v1229_v8 = vcvt.s32.f32 %v2396_v6  ;;  %vm1240_vm12 = vcmask 1041408   ;;  %v1668_v9 = vld [vmem:[#allocation2] sm:$0xff]   ;;  %v2139_v14 = vmov 0   ;;  %v1319_v15 = vadd.s32 8, %v2396_v6  ;;  %v1654_v24 = vld [vmem:[#allocation5] ss:$0 sm:$0xff] }
 0x266   : > { %v1669_v11 = vunpack.c.l.bf16 %v1668_v9  ;;  %v1670_v12 = vunpack.c.h.bf16 %v1668_v9  ;;  %1930 = vset.pattern.permute.xlu1 %v2139_v14  ;;  %1931 = vset.pattern.permute.xlu0 %v2139_v14  ;;  %v2140_v20 = vmov 0.0   ;;  %vm2141_vm13 = vmmov 0  }
 0x267   : > { %1743 = vmatprep.subr.msk.mxu0 %vm1240_vm12, %v1229_v8  ;;  %v1213_v13 = vld [vmem:[#allocation4] sm:$0xff]  ;;  %v1320_v16 = vcvt.s32.f32 %v1319_v15  ;;  %1748 = vmatprep.subr.mxu1 %v2140_v20  ;;  %v1222_v25 = vand.u32 127, %v1116_v2  ;;  %v1223_v26 = vmul.u32 8, %v2396_v6  ;;  %vm1352_vm3 = vcmask 130048  }
 0x268   : > { %1744 = vmatpush3.msk.msra.mxu0 %vm1240_vm12, %v1229_v8  ;;  %1745 = vmatprep.mubr.msk.f32.mxu0 %vm1127_vm11, %v1669_v11  ;;  %vm1426_vm4 = vcmask 58368  }
 0x269   : > { %1746 = vmatmul.mubr.msk.f32.vlgmr.msra.gmra.mxu0 %vm1127_vm11, %v1670_v12  ;;  %1752 = vmatprep.mubr.msk.f32.mxu1 %vm2141_vm13, %v2140_v20  ;;  %v1325_v27 = vcvt.s32.f32 %v1222_v25  ;;  %v1225_v28 = vadd.s32 8, %v1223_v26  ;;  %vm1224_vm15 = vcmp.ge.s32.totalorder %v1222_v25, %v1223_v26 }
 0x26b   : > { %v1214_v10 = vld [vmem:[#allocation4 + $0x8] sm:$0xff]  ;;  %vm1226_vm0 = vcmp.lt.s32.totalorder %v1222_v25, %v1225_v28 }
 0x26c   : > { %1217 = vadd.xlane.f32.xlu0 %v1214_v10  ;;  %vm1227_vm1 = vmand %vm1224_vm15, %vm1226_vm0 }
 0x26d   : > { %v1228_v2 = vsel %vm1227_vm1, 1.0, %v2140_v20 }
 0x270   : > { %1215 = vadd.xlane.f32.xlu0 %v1213_v13 }
 0x286   : > { %1349 = vperm.xlu0 %1931, %v1654_v24  }
 0x2f5   : > { %v1218_v29 = vpop.xlane.xlu0 %1217 }
 0x2f9   : > { %v1216_v34 = vpop.xlane.xlu0 %1215 }
 0x301   : > { %v1350_v6 = vpop.permute.xlu0 %1349 }
 0x329   : > { %v1747_v17 = vpop.f32.mrf.mxu0 }
 0x32a   : > { %v1322_v18 = vmul.f32 8.0, %v1747_v17 }
 0x32b   : > { %v1310_v19 = vpop.f32.mrf.mxu0 }
 0x32c   : > { %v1321_v21 = vmul.f32 8.0, %v1310_v19  ;;  %v1324_v22 = vsub.f32 %v1320_v16, %v1322_v18 }
 0x32e   : > { %1333 = vperm.xlu1 %1930, %v1324_v22   ;;  %v1323_v23 = vsub.f32 %v1229_v8, %v1321_v21 }
 0x332   : > { %1328 = vperm.xlu1 %1930, %v1323_v23  }
 0x3a9   : > { %v1334_v30 = vpop.permute.xlu1 %1333 }
 0x3aa   : > { %vm1337_vm14 = vcmp.eq.f32.partialorder %v1334_v30, %v1325_v27 }
 0x3ab   : > { %v1339_v31 = vsel %vm1337_vm14, 1.0, %v2140_v20 }
 0x3ac   : > { %v1341_v32 = vmul.f32 %v1339_v31, %v1218_v29 }
 0x3ad   : > { %v1329_v33 = vpop.permute.xlu1 %1328 }
 0x3ae   : > { %vm1336_vm2 = vcmp.eq.f32.partialorder %v1329_v33, %v1325_v27  ;;  %1749 = vmatpush3.msra.mxu1 %v1341_v32 }
 0x3af   : > { %v1338_v35 = vsel %vm1336_vm2, 1.0, %v2140_v20  ;;  %1750 = vmatprep.subr.mxu1 %v2140_v20 }
 0x3b0   : > { %v1340_v36 = vmul.f32 %v1338_v35, %v1216_v34 }
 0x3b2   : > { %1751 = vmatpush3.msra.mxu1 %v1340_v36 }
 0x3b3   : > { %1753 = vmatmul.mubr.msk.f32.vlgmr.msra.gmra.mxu1 %vm1352_vm3, %v1228_v2 }
 0x473   : > { %v1422_v37 = vpop.f32.mrf.mxu1 }
 0x474   : > { %v1423_v38 = vadd.f32 %v1422_v37, %v1350_v6 }
 0x475   : > { %v1754_v39 = vpop.f32.mrf.mxu1 }
 0x476   : > { %1427 = vst.msk [vmem:[#allocation14] sm:$0x3] %vm1426_vm4, %v1423_v38 }
 0x477 PF: > { %s2503_s18 = sadd.s32 4294967295, %s2124_s20   ;;  %s2142_s23 = smov [#allocation14]  }
 0x478   : > { %p2444_p13 = scmp.eq.s32.totalorder %s2503_s18, 1  ;;  %s1437_s21 = sshll.u32 %s2142_s23, 4  ;;  %s1438_s21 = int_to_ptr.vmem [resolvable:$true] %s1437_s21 }
 0x479   : > { %s2038_s11 = scalar_lea.vmem %s1438_s21, 32  ;;  %p2045_p6 = scmp.lt.s32.totalorder %s1438_s21, %s1438_s21 }
 0x47a   : > { %p2039_p2 = scmp.ne.s32.totalorder %s1438_s21, %s2038_s11  ;;  %p2046_p9 = scmp.lt.s32.totalorder %s2038_s11, %s2038_s11 }
 0x47c   : > { %p2040_p10 = pnand %p2039_p2, %p2444_p13  ;;  %p2047_p5 = por %p2046_p9, %p2045_p6 }
 0x47e   : > { %p2041_p4 = pneg %p2040_p10 }
 0x480   : > { %p2048_p7 = pnand %p2047_p5, %p2041_p4 }
 0x482   : > { %2051 = shalt.err (!%p2048_p7)
}
 0x483   : > { %s2505_s13 = sld [smem:[#allocation22_spill]] }
 0x489   : > { %1770 = dma.vmem_to_hbm [thread:$0]  (%p2444_p13), %s1438_s21, 32, %s2505_s13, [#allocation8]  }
 0x48a   : > { %2099 = dma.done.wait (%p2444_p13), [#allocation8], 32  }
 0x48b   : > { %2101 = vsyncadd (%p2444_p13), [#allocation8], 4294967264 }
 0x48c PF: > { %s28_s20 = sadd.s32 1, %s2124_s20   ;;  %s2506_s15 = smov %s2108_s16 }
 0x48d   : > { %p25_p11 = scmp.ge.s32.totalorder %s28_s20, 4   ;;  %s2507_s16 = smov %s2112_s17 }
 0x48e   : > { %s2508_s17 = smov %s2314_s29  ;;  %s2509_s18 = smov %s2120_s19 }
 0x48f   : > { %s2510_s19 = smov %s2512_s28  ;;  %27 = sbr.rel (!%p25_p11) target bundleno = 12 (0xc), region = 129 }
 0x494   :  { %1450 = vsyncpa [#allocation7], 1 }
 0x495   :  { %1452 = vsyncpa [#allocation7 + $0x1], 1 }
 0x496   :  { %1453 = vsyncpa [#allocation10], 1 }
 0x497   :  { %1454 = vsyncpa [#allocation13], 1 }
 0x498   :  { %1456 = vsyncpa [#allocation13 + $0x1], 1 }
 0x499   :  { %1457 = vsyncpa [#allocation8], 1 }
 0x49a   :  { %1459 = vsyncpa [#allocation8 + $0x1], 1 }

</bundles_post_ra>
